<compile_context>
chip_gen: v7x
topology: tpu7x:2x2x1
jax: 0.10.0
libtpu: 0.0.40
codegen_flags: <defaults>
</compile_context>

<pallas_src>
import jax
import jax.numpy as jnp
from jax.experimental import pallas as pl
from jax.experimental.pallas import tpu as pltpu

_LANE = 128
_SUBLANE = 8
_ROW_ALIGN = 32          # keeps int8 / bf16 / f32 input blocks tile-aligned
_MAX_TILE_ROWS = 4096    # 4096*128 elems -> 2 MiB f32 per input tile
_PAD_LOGIT = -1e9        # padded logit: exp(-|x|)=0, log1p(0)=0, sigmoid=0


def _cdiv(a, b):
    return -(-a // b)


def _round_up(a, b):
    return _cdiv(a, b) * b


def _bce_dice_partials_kernel(x_ref, t_ref, o_ref,
                              bce_acc, inter_acc, psum_acc, tsum_acc):
    k = pl.program_id(2)

    @pl.when(k == 0)
    def _init():
        bce_acc[...] = jnp.zeros_like(bce_acc)
        inter_acc[...] = jnp.zeros_like(inter_acc)
        psum_acc[...] = jnp.zeros_like(psum_acc)
        tsum_acc[...] = jnp.zeros_like(tsum_acc)

    x = x_ref[...].astype(jnp.float32)      # (tile_rows, 128) logits
    t = t_ref[...].astype(jnp.float32)      # int8 / f32 target -> f32

    # One exp per element, shared by the stable BCE term and the sigmoid.
    e = jnp.exp(-jnp.abs(x))
    # Stable BCE-with-logits: max(x,0) - x*t + log1p(exp(-|x|))
    bce_elem = jnp.maximum(x, 0.0) - x * t + jnp.log1p(e)

    # sigmoid(x) = where(x>=0, 1, e) / (1+e); approx reciprocal + one Newton
    # refinement (VPU) keeps ~f32 accuracy while freeing the EUP divide.
    denom = 1.0 + e
    r = pl.reciprocal(denom, approx=True)
    r = r * (2.0 - denom * r)
    p = jnp.where(x >= 0.0, 1.0, e) * r

    def _rowsum8(q):
        # (tile_rows,128) -> (tile_rows//8, 8, 128) -> (8,128).  The inner
        # (8,128) tile stays intact, so this is a layout-preserving VALU sum.
        return jnp.sum(q.reshape(-1, _SUBLANE, _LANE), axis=0)

    bce_acc[...] += _rowsum8(bce_elem)
    inter_acc[...] += _rowsum8(p * t)
    psum_acc[...] += _rowsum8(p)
    tsum_acc[...] += _rowsum8(t)

    @pl.when(k == pl.num_programs(2) - 1)
    def _finalize():
        # One cross-sublane reduce per quantity, then a single unmasked store.
        o_ref[...] = jnp.concatenate(
            [jnp.sum(bce_acc[...], axis=0, keepdims=True),
             jnp.sum(inter_acc[...], axis=0, keepdims=True),
             jnp.sum(psum_acc[...], axis=0, keepdims=True),
             jnp.sum(tsum_acc[...], axis=0, keepdims=True)],
            axis=0)


def bce_dice_loss(logits, target, *, binary_target=True):
    """logits, target: (N, C, H, W). Returns scalar f32 loss = 0.5*BCE + DiceLoss.

    binary_target=True ships the mask as int8 (exact for {0,1}); use
    binary_target=False for soft/probabilistic targets (ships f32).
    """
    n = logits.shape[0]
    x2 = logits.reshape(n, -1)
    d = x2.shape[1]

    # ---- tiling: balanced chunks, padded rows instead of divisor search ----
    rows_total = _cdiv(d, _LANE)
    kd0 = _cdiv(rows_total, _MAX_TILE_ROWS)
    # Split the reduction axis across an extra "parallel" grid dim when the
    # sample axis alone gives odd / single parallel work (v7x has 2 TCs).
    n_outer = 2 if (n % 2 == 1 and kd0 >= 2) else 1
    n_inner = _cdiv(kd0, n_outer)
    kd = n_outer * n_inner
    tile_rows = _round_up(_cdiv(rows_total, kd), _ROW_ALIGN)
    rows_padded = tile_rows * kd
    d_padded = rows_padded * _LANE

    # ---- wrapper-side padding: contributes exactly zero to every partial ---
    if d_padded != d:
        x2 = jnp.pad(x2, ((0, 0), (0, d_padded - d)),
                     constant_values=_PAD_LOGIT)
    t2 = target.reshape(n, -1)
    t2 = t2.astype(jnp.int8) if binary_target else t2.astype(jnp.float32)
    if d_padded != d:
        t2 = jnp.pad(t2, ((0, 0), (0, d_padded - d)))

    x3 = x2.reshape(n, rows_padded, _LANE)
    t3 = t2.reshape(n, rows_padded, _LANE)

    partials = pl.pallas_call(
        _bce_dice_partials_kernel,
        out_shape=jax.ShapeDtypeStruct((n, n_outer, 4, _LANE), jnp.float32),
        grid=(n, n_outer, n_inner),
        in_specs=[
            pl.BlockSpec((None, tile_rows, _LANE),
                         lambda i, j, k: (i, j * n_inner + k, 0)),
            pl.BlockSpec((None, tile_rows, _LANE),
                         lambda i, j, k: (i, j * n_inner + k, 0)),
        ],
        out_specs=pl.BlockSpec((None, None, 4, _LANE),
                               lambda i, j, k: (i, j, 0, 0)),
        scratch_shapes=[pltpu.VMEM((_SUBLANE, _LANE), jnp.float32)
                        for _ in range(4)],
        compiler_params=pltpu.CompilerParams(
            dimension_semantics=("parallel", "parallel", "arbitrary"),
            vmem_limit_bytes=48 * 1024 * 1024,
        ),
    )(x3, t3)

    # ---- tiny final combine (N x n_outer x 4 x 128 values) in plain JAX ----
    per_sample = jnp.sum(partials, axis=1)             # (N, 4, 128)
    bce_sum = jnp.sum(per_sample[:, 0, :])
    inter = jnp.sum(per_sample[:, 1, :], axis=-1)       # (N,)
    p_sum = jnp.sum(per_sample[:, 2, :], axis=-1)       # (N,)
    t_sum = jnp.sum(per_sample[:, 3, :], axis=-1)       # (N,)

    bce = bce_sum / (n * d)
    smooth = 1e-5
    dice = (2.0 * inter + smooth) / (p_sum + t_sum + smooth)
    dice_loss = 1.0 - jnp.sum(dice) / n
    return 0.5 * bce + dice_loss


def _reference(logits, target):
    # Pure-JAX reference mirroring the PyTorch forward.
    x = logits.astype(jnp.float32)
    t = target.astype(jnp.float32)
    bce = jnp.mean(jnp.maximum(x, 0.0) - x * t + jnp.log1p(jnp.exp(-jnp.abs(x))))
    smooth = 1e-5
    n = x.shape[0]
    p = jax.nn.sigmoid(x).reshape(n, -1)
    tt = t.reshape(n, -1)
    inter = jnp.sum(p * tt, axis=1)
    dice = (2.0 * inter + smooth) / (jnp.sum(p, axis=1) + jnp.sum(tt, axis=1) + smooth)
    dice_loss = 1.0 - jnp.sum(dice) / n
    return 0.5 * bce + dice_loss


if __name__ == "__main__":
    key = jax.random.PRNGKey(0)
    k1, k2 = jax.random.split(key)
    # Small segmentation-like shapes: N=2, C=4, H=W=16 (D = 1024 per sample).
    logits = jax.random.normal(k1, (2, 4, 16, 16), dtype=jnp.float32)
    target = (jax.random.uniform(k2, (2, 4, 16, 16)) > 0.5).astype(jnp.float32)

    loss = jax.block_until_ready(bce_dice_loss(logits, target))
    ref = jax.block_until_ready(_reference(logits, target))

    assert jnp.allclose(loss, ref, rtol=1e-5, atol=1e-5), (loss, ref)
    print("KERNEL_OK")
</pallas_src>

<mosaic_0001>
module attributes {stable_mosaic.version = 11 : i64} {
  func.func @_bce_dice_partials_kernel(%arg0: i32, %arg1: i32, %arg2: i32, %arg3: memref<1x32x128xf32, #tpu.memory_space<vmem>>, %arg4: memref<1x32x128xi8, #tpu.memory_space<vmem>>, %arg5: memref<1x1x4x128xf32, #tpu.memory_space<vmem>>, %arg6: memref<8x128xf32, #tpu.memory_space<vmem>>, %arg7: memref<8x128xf32, #tpu.memory_space<vmem>>, %arg8: memref<8x128xf32, #tpu.memory_space<vmem>>, %arg9: memref<8x128xf32, #tpu.memory_space<vmem>>) attributes {dimension_semantics = [#tpu.dimension_semantics<parallel>, #tpu.dimension_semantics<parallel>, #tpu.dimension_semantics<arbitrary>], iteration_bounds = array<i64: 2, 1, 1>, scalar_prefetch = 0 : i64, scratch_operands = 4 : i64, tpu.core_type = #tpu.core_type<tc>, window_params = [{transform_indices = @transform_0, window_bounds = array<i64: 1, 32, 128>}, {transform_indices = @transform_1, window_bounds = array<i64: 1, 32, 128>}, {transform_indices = @transform_2, window_bounds = array<i64: 1, 1, 4, 128>}]} {
    %c0_i32 = arith.constant 0 : i32
    %0 = arith.cmpi eq, %arg2, %c0_i32 : i32
    %1 = arith.extui %0 : i1 to i32
    %c0_i32_0 = arith.constant 0 : i32
    %2 = arith.cmpi ne, %1, %c0_i32_0 : i32
    scf.if %2 {
      %cst_33 = arith.constant 0.000000e+00 : f32
      %54 = vector.broadcast %cst_33 : f32 to vector<8x128xf32>
      %c0_34 = arith.constant 0 : index
      %c0_35 = arith.constant 0 : index
      %55 = vector.load %arg6[%c0_34, %c0_35] : memref<8x128xf32, #tpu.memory_space<vmem>>, vector<8x128xf32>
      tpu.vector_store %arg6[%c0_34, %c0_35], %54 {strides = array<i32>} : memref<8x128xf32, #tpu.memory_space<vmem>>, vector<8x128xf32>,
      %cst_36 = arith.constant 0.000000e+00 : f32
      %56 = vector.broadcast %cst_36 : f32 to vector<8x128xf32>
      %c0_37 = arith.constant 0 : index
      %c0_38 = arith.constant 0 : index
      %57 = vector.load %arg7[%c0_37, %c0_38] : memref<8x128xf32, #tpu.memory_space<vmem>>, vector<8x128xf32>
      tpu.vector_store %arg7[%c0_37, %c0_38], %56 {strides = array<i32>} : memref<8x128xf32, #tpu.memory_space<vmem>>, vector<8x128xf32>,
      %cst_39 = arith.constant 0.000000e+00 : f32
      %58 = vector.broadcast %cst_39 : f32 to vector<8x128xf32>
      %c0_40 = arith.constant 0 : index
      %c0_41 = arith.constant 0 : index
      %59 = vector.load %arg8[%c0_40, %c0_41] : memref<8x128xf32, #tpu.memory_space<vmem>>, vector<8x128xf32>
      tpu.vector_store %arg8[%c0_40, %c0_41], %58 {strides = array<i32>} : memref<8x128xf32, #tpu.memory_space<vmem>>, vector<8x128xf32>,
      %cst_42 = arith.constant 0.000000e+00 : f32
      %60 = vector.broadcast %cst_42 : f32 to vector<8x128xf32>
      %c0_43 = arith.constant 0 : index
      %c0_44 = arith.constant 0 : index
      %61 = vector.load %arg9[%c0_43, %c0_44] : memref<8x128xf32, #tpu.memory_space<vmem>>, vector<8x128xf32>
      tpu.vector_store %arg9[%c0_43, %c0_44], %60 {strides = array<i32>} : memref<8x128xf32, #tpu.memory_space<vmem>>, vector<8x128xf32>,
    } else {
    }
    %c0 = arith.constant 0 : index
    %c0_1 = arith.constant 0 : index
    %c0_2 = arith.constant 0 : index
    %3 = vector.load %arg3[%c0, %c0_1, %c0_2] : memref<1x32x128xf32, #tpu.memory_space<vmem>>, vector<1x32x128xf32>
    %4 = vector.shape_cast %3 : vector<1x32x128xf32> to vector<32x128xf32>
    %c0_3 = arith.constant 0 : index
    %c0_4 = arith.constant 0 : index
    %c0_5 = arith.constant 0 : index
    %5 = vector.load %arg4[%c0_3, %c0_4, %c0_5] : memref<1x32x128xi8, #tpu.memory_space<vmem>>, vector<1x32x128xi8>
    %6 = vector.shape_cast %5 : vector<1x32x128xi8> to vector<32x128xi8>
    %7 = arith.sitofp %6 : vector<32x128xi8> to vector<32x128xf32>
    %8 = math.absf %4 : vector<32x128xf32>
    %cst = arith.constant 0.000000e+00 : f32
    %9 = vector.broadcast %cst : f32 to vector<32x128xf32>
    %10 = arith.subf %9, %8 : vector<32x128xf32>
    %11 = math.exp %10 : vector<32x128xf32>
    %cst_6 = arith.constant 0.000000e+00 : f32
    %12 = vector.broadcast %cst_6 : f32 to vector<32x128xf32>
    %13 = arith.maximumf %4, %12 : vector<32x128xf32>
    %14 = arith.mulf %4, %7 : vector<32x128xf32>
    %15 = arith.subf %13, %14 : vector<32x128xf32>
    %16 = math.log1p %11 : vector<32x128xf32>
    %17 = arith.addf %15, %16 : vector<32x128xf32>
    %cst_7 = arith.constant 1.000000e+00 : f32
    %18 = vector.broadcast %cst_7 : f32 to vector<32x128xf32>
    %19 = arith.addf %18, %11 : vector<32x128xf32>
    %20 = tpu.reciprocal %19 {approx = true} : vector<32x128xf32> -> vector<32x128xf32>
    %21 = arith.mulf %19, %20 : vector<32x128xf32>
    %cst_8 = arith.constant 2.000000e+00 : f32
    %22 = vector.broadcast %cst_8 : f32 to vector<32x128xf32>
    %23 = arith.subf %22, %21 : vector<32x128xf32>
    %24 = arith.mulf %20, %23 : vector<32x128xf32>
    %cst_9 = arith.constant 0.000000e+00 : f32
    %25 = vector.broadcast %cst_9 : f32 to vector<32x128xf32>
    %26 = arith.cmpf oge, %4, %25 : vector<32x128xf32>
    %cst_10 = arith.constant 1.000000e+00 : f32
    %27 = vector.broadcast %cst_10 : f32 to vector<32x128xf32>
    %28 = arith.select %26, %27, %11 : vector<32x128xi1>, vector<32x128xf32>
    %29 = arith.mulf %28, %24 : vector<32x128xf32>
    %c0_11 = arith.constant 0 : index
    %c0_12 = arith.constant 0 : index
    %30 = vector.load %arg6[%c0_11, %c0_12] : memref<8x128xf32, #tpu.memory_space<vmem>>, vector<8x128xf32>
    %31 = vector.shape_cast %17 : vector<32x128xf32> to vector<4x8x128xf32>
    %cst_13 = arith.constant dense<0.000000e+00> : vector<8x128xf32>
    %32 = vector.multi_reduction <add>, %31, %cst_13 [0] : vector<4x8x128xf32> to vector<8x128xf32>
    %33 = arith.addf %30, %32 : vector<8x128xf32>
    %c0_14 = arith.constant 0 : index
    %c0_15 = arith.constant 0 : index
    %34 = vector.load %arg6[%c0_14, %c0_15] : memref<8x128xf32, #tpu.memory_space<vmem>>, vector<8x128xf32>
    tpu.vector_store %arg6[%c0_14, %c0_15], %33 {strides = array<i32>} : memref<8x128xf32, #tpu.memory_space<vmem>>, vector<8x128xf32>,
    %c0_16 = arith.constant 0 : index
    %c0_17 = arith.constant 0 : index
    %35 = vector.load %arg7[%c0_16, %c0_17] : memref<8x128xf32, #tpu.memory_space<vmem>>, vector<8x128xf32>
    %36 = arith.mulf %29, %7 : vector<32x128xf32>
    %37 = vector.shape_cast %36 : vector<32x128xf32> to vector<4x8x128xf32>
    %cst_18 = arith.constant dense<0.000000e+00> : vector<8x128xf32>
    %38 = vector.multi_reduction <add>, %37, %cst_18 [0] : vector<4x8x128xf32> to vector<8x128xf32>
    %39 = arith.addf %35, %38 : vector<8x128xf32>
    %c0_19 = arith.constant 0 : index
    %c0_20 = arith.constant 0 : index
    %40 = vector.load %arg7[%c0_19, %c0_20] : memref<8x128xf32, #tpu.memory_space<vmem>>, vector<8x128xf32>
    tpu.vector_store %arg7[%c0_19, %c0_20], %39 {strides = array<i32>} : memref<8x128xf32, #tpu.memory_space<vmem>>, vector<8x128xf32>,
    %c0_21 = arith.constant 0 : index
    %c0_22 = arith.constant 0 : index
    %41 = vector.load %arg8[%c0_21, %c0_22] : memref<8x128xf32, #tpu.memory_space<vmem>>, vector<8x128xf32>
    %42 = vector.shape_cast %29 : vector<32x128xf32> to vector<4x8x128xf32>
    %cst_23 = arith.constant dense<0.000000e+00> : vector<8x128xf32>
    %43 = vector.multi_reduction <add>, %42, %cst_23 [0] : vector<4x8x128xf32> to vector<8x128xf32>
    %44 = arith.addf %41, %43 : vector<8x128xf32>
    %c0_24 = arith.constant 0 : index
    %c0_25 = arith.constant 0 : index
    %45 = vector.load %arg8[%c0_24, %c0_25] : memref<8x128xf32, #tpu.memory_space<vmem>>, vector<8x128xf32>
    tpu.vector_store %arg8[%c0_24, %c0_25], %44 {strides = array<i32>} : memref<8x128xf32, #tpu.memory_space<vmem>>, vector<8x128xf32>,
    %c0_26 = arith.constant 0 : index
    %c0_27 = arith.constant 0 : index
    %46 = vector.load %arg9[%c0_26, %c0_27] : memref<8x128xf32, #tpu.memory_space<vmem>>, vector<8x128xf32>
    %47 = vector.shape_cast %7 : vector<32x128xf32> to vector<4x8x128xf32>
    %cst_28 = arith.constant dense<0.000000e+00> : vector<8x128xf32>
    %48 = vector.multi_reduction <add>, %47, %cst_28 [0] : vector<4x8x128xf32> to vector<8x128xf32>
    %49 = arith.addf %46, %48 : vector<8x128xf32>
    %c0_29 = arith.constant 0 : index
    %c0_30 = arith.constant 0 : index
    %50 = vector.load %arg9[%c0_29, %c0_30] : memref<8x128xf32, #tpu.memory_space<vmem>>, vector<8x128xf32>
    tpu.vector_store %arg9[%c0_29, %c0_30], %49 {strides = array<i32>} : memref<8x128xf32, #tpu.memory_space<vmem>>, vector<8x128xf32>,
    %c0_i32_31 = arith.constant 0 : i32
    %51 = arith.cmpi eq, %arg2, %c0_i32_31 : i32
    %52 = arith.extui %51 : i1 to i32
    %c0_i32_32 = arith.constant 0 : i32
    %53 = arith.cmpi ne, %52, %c0_i32_32 : i32
    scf.if %53 {
      %c0_33 = arith.constant 0 : index
      %c0_34 = arith.constant 0 : index
      %54 = vector.load %arg6[%c0_33, %c0_34] : memref<8x128xf32, #tpu.memory_space<vmem>>, vector<8x128xf32>
      %cst_35 = arith.constant dense<0.000000e+00> : vector<128xf32>
      %55 = vector.multi_reduction <add>, %54, %cst_35 [0] : vector<8x128xf32> to vector<128xf32>
      %56 = vector.shape_cast %55 : vector<128xf32> to vector<1x128xf32>
      %c0_36 = arith.constant 0 : index
      %c0_37 = arith.constant 0 : index
      %57 = vector.load %arg7[%c0_36, %c0_37] : memref<8x128xf32, #tpu.memory_space<vmem>>, vector<8x128xf32>
      %cst_38 = arith.constant dense<0.000000e+00> : vector<128xf32>
      %58 = vector.multi_reduction <add>, %57, %cst_38 [0] : vector<8x128xf32> to vector<128xf32>
      %59 = vector.shape_cast %58 : vector<128xf32> to vector<1x128xf32>
      %c0_39 = arith.constant 0 : index
      %c0_40 = arith.constant 0 : index
      %60 = vector.load %arg8[%c0_39, %c0_40] : memref<8x128xf32, #tpu.memory_space<vmem>>, vector<8x128xf32>
      %cst_41 = arith.constant dense<0.000000e+00> : vector<128xf32>
      %61 = vector.multi_reduction <add>, %60, %cst_41 [0] : vector<8x128xf32> to vector<128xf32>
      %62 = vector.shape_cast %61 : vector<128xf32> to vector<1x128xf32>
      %c0_42 = arith.constant 0 : index
      %c0_43 = arith.constant 0 : index
      %63 = vector.load %arg9[%c0_42, %c0_43] : memref<8x128xf32, #tpu.memory_space<vmem>>, vector<8x128xf32>
      %cst_44 = arith.constant dense<0.000000e+00> : vector<128xf32>
      %64 = vector.multi_reduction <add>, %63, %cst_44 [0] : vector<8x128xf32> to vector<128xf32>
      %65 = vector.shape_cast %64 : vector<128xf32> to vector<1x128xf32>
      %66 = tpu.concatenate %56, %59, %62, %65 in 0 : vector<1x128xf32>, vector<1x128xf32>, vector<1x128xf32>, vector<1x128xf32> -> vector<4x128xf32>
      %c0_45 = arith.constant 0 : index
      %c0_46 = arith.constant 0 : index
      %c0_47 = arith.constant 0 : index
      %c0_48 = arith.constant 0 : index
      %67 = vector.load %arg5[%c0_45, %c0_46, %c0_47, %c0_48] : memref<1x1x4x128xf32, #tpu.memory_space<vmem>>, vector<1x1x4x128xf32>
      %68 = vector.shape_cast %67 : vector<1x1x4x128xf32> to vector<4x128xf32>
      %69 = vector.shape_cast %66 : vector<4x128xf32> to vector<1x1x4x128xf32>
      tpu.vector_store %arg5[%c0_45, %c0_46, %c0_47, %c0_48], %69 {strides = array<i32>} : memref<1x1x4x128xf32, #tpu.memory_space<vmem>>, vector<1x1x4x128xf32>,
    } else {
    }
    return
  }
  func.func @transform_0(%arg0: i32, %arg1: i32, %arg2: i32) -> (i32, i32, i32) {
    %c1_i32 = arith.constant 1 : i32
    %0 = arith.muli %arg1, %c1_i32 : i32
    %1 = arith.addi %0, %arg2 : i32
    %c0_i32 = arith.constant 0 : i32
    %c0_i32_0 = arith.constant 0 : i32
    return %arg0, %1, %c0_i32 : i32, i32, i32
  }
  func.func @transform_1(%arg0: i32, %arg1: i32, %arg2: i32) -> (i32, i32, i32) {
    %c1_i32 = arith.constant 1 : i32
    %0 = arith.muli %arg1, %c1_i32 : i32
    %1 = arith.addi %0, %arg2 : i32
    %c0_i32 = arith.constant 0 : i32
    %c0_i32_0 = arith.constant 0 : i32
    return %arg0, %1, %c0_i32 : i32, i32, i32
  }
  func.func @transform_2(%arg0: i32, %arg1: i32, %arg2: i32) -> (i32, i32, i32, i32) {
    %c0_i32 = arith.constant 0 : i32
    %c0_i32_0 = arith.constant 0 : i32
    %c0_i32_1 = arith.constant 0 : i32
    return %arg0, %arg1, %c0_i32, %c0_i32_0 : i32, i32, i32, i32
  }
}

</mosaic_0001>

<bundles_post_ra>
// kernel: tpu_custom_call.1
= control target key start
LH: loop header
LB: loop body
LE: loop exit
PB: predicated region body
PF: predicated region fallthrough
CT: control target
= control target key end

     0   :  { %7 = vsyncpa [#allocation7], 0  ;;  %s1168_s0 = inlined_call_operand.hbm [shape: f32[2,32,128], index: 0, kind: input, shape index: {}]   ;;  %s1169_s1 = inlined_call_operand.hbm [shape: s8[2,32,128], index: 1, kind: input, shape index: {}]   ;;  %s1170_s2 = inlined_call_operand.hbm [shape: f32[2,1,4,128], index: 2, kind: output, shape index: {}]  }
   0x1   :  { %9 = vsyncpa [#allocation7 + $0x1], 0 }
   0x2   :  { %10 = vsyncpa [#allocation10], 0 }
   0x3   :  { %12 = vsyncpa [#allocation10 + $0x1], 0 }
   0x4   :  { %13 = vsyncpa [#allocation8], 0 }
   0x5   :  { %15 = vsyncpa [#allocation8 + $0x1], 0  ;;  %s828_s9 = smov 0   ;;  %s830_s10 = smov 0  }
   0x6   :  { %s832_s11 = smov 0   ;;  %s834_s12 = smov 0  }
   0x7   :  { %s836_s13 = smov 0   ;;  %s838_s14 = smov 0  }
   0x8 LB: > { %s549_s15 = sadd.s32 4294967295, %s806_s14   ;;  %s550_s16 = sadd.s32 4294967294, %s806_s14   ;;  %s806_s14 = sphi %s838_s14, %s21_s14   ;;  %s802_s13 = sphi %s836_s13, %s1197_s13   ;;  %s798_s12 = sphi %s834_s12, %s1196_s12   ;;  %s794_s11 = sphi %s832_s11, %s1195_s11   ;;  %s790_s10 = sphi %s830_s10, %s1194_s10   ;;  %s786_s9 = sphi %s828_s9, %s1193_s9  }
   0x9   : > { %s40_s17 = sadd.s32 1, %s802_s13  ;;  %s51_s18 = sadd.s32 1, %s794_s11 }
   0xa   : > { %p42_p0 = scmp.ge.s32.totalorder %s40_s17, 2  ;;  %p58_p1 = scmp.ne.s32.totalorder %s794_s11, %s790_s10 }
   0xb   : > { %p59_p2 = scmp.eq.s32.totalorder %s806_s14, 0  ;;  %p64_p3 = scmp.ne.s32.totalorder %s790_s10, %s786_s9 }
   0xc   : > { %s1199_s17 = smov (%p42_p0, %s40_s17), 0  ;;  %p65_p5 = scmp.eq.s32.totalorder %s549_s15, 0 }
   0xd   : > { %p869_p4 = por %p59_p2, %p58_p1  ;;  %s46_s20 = ssub.s32 %s802_s13, %s1199_s17 }
   0xe   : > { %p120_p6 = scmp.eq.s32.totalorder %s549_s15, 1  ;;  %p49_p7 = scmp.eq.s32.totalorder %s46_s20, 0 }
   0xf   : > { %p875_p8 = por %p65_p5, %p64_p3  ;;  %p126_p10 = scmp.eq.s32.totalorder %s550_s16, 1 }
  0x10   : > { %p879_p9 = por %p120_p6, %p58_p1  ;;  %p584_p13 = scmp.lt.s32.totalorder %s806_s14, 2 }
  0x11   : > { %s1174_s21 = scalar_select %p875_p8, 1, 0 }
  0x12   : > { %s1175_s22 = scalar_select %p879_p9, 1, 0 }
  0x13   : > { %s884_s23 = scalar_select %p49_p7, %s794_s11, %s51_s18  }
  0x14   : > { %p886_p11 = por %p126_p10, %p64_p3  ;;  %s893_s25 = sand.u32 1, %s794_s11  }
  0x15   : > { %s553_s26 = sshll.u32 %s893_s25, 5  ;;  %s566_s27 = sshll.u32 %s802_s13, 9 }
  0x16   : > { %s1176_s24 = scalar_select %p886_p11, 1, 0 }
  0x17   : > { %s900_s30 = scalar_lea.hbm %s1168_s0, %s566_s27  ;;  %s150_s3 = scalar_lea.vmem [#allocation6], %s553_s26 }
  0x18   : > { %s160_s4 = sshll.u32 %s150_s3, 4  ;;  %p906_p0 = pnand %p584_p13, %p869_p4  ;;  %s902_s4 = int_to_ptr.vmem [resolvable:$true] %s160_s4 }
  0x19   : > { %s147_s6 = scalar_lea.sflag [#allocation7], %s893_s25  ;;  %s660_s7 = scalar_lea.hbm %s900_s30, 512 }
  0x1a   : > { %p661_p2 = scmp.ne.s32.totalorder %s900_s30, %s660_s7  ;;  %p662_p3 = pneg %p906_p0 }
  0x1b   : > { %s665_s16 = scalar_lea.hbm %s1168_s0, 1024  ;;  %p666_p4 = scmp.lt.u32.totalorder %s900_s30, %s1168_s0 }
  0x1c   : > { %p663_p5 = pnand %p662_p3, %p661_p2  ;;  %p667_p7 = scmp.lt.u32.totalorder %s665_s16, %s660_s7 }
  0x1d   : > { %p669_p13 = scmp.lt.u32.totalorder %s660_s7, %s900_s30 }
  0x1e   : > { %p664_p6 = pneg %p663_p5  ;;  %p668_p10 = por %p667_p7, %p666_p4 }
  0x20   : > { %p670_p12 = por %p669_p13, %p668_p10 }
  0x22   : > { %p671_p1 = pnand %p670_p12, %p664_p6 }
  0x24   : > { %674 = shalt.err (!%p671_p1)
}
  0x25   : > { %s675_s20 = scalar_lea.vmem %s902_s4, 512  ;;  %s808_s26 = smov [#allocation6]  }
  0x26   : > { %p676_p2 = scmp.ne.s32.totalorder %s902_s4, %s675_s20  ;;  %s680_s27 = sshll.u32 %s808_s26, 4  ;;  %s681_s27 = int_to_ptr.vmem [resolvable:$false] %s680_s27 }
  0x27   : > { %s682_s28 = scalar_lea.vmem %s681_s27, 1024  ;;  %p683_p9 = scmp.lt.s32.totalorder %s902_s4, %s681_s27 }
  0x28   : > { %p678_p5 = pnand %p676_p2, %p662_p3  ;;  %p684_p4 = scmp.lt.s32.totalorder %s682_s28, %s675_s20 }
  0x2a   : > { %p679_p11 = pneg %p678_p5  ;;  %p685_p7 = por %p684_p4, %p683_p9 }
  0x2c   : > { %p686_p10 = pnand %p685_p7, %p679_p11 }
  0x2e   : > { %689 = shalt.err (!%p686_p10)
}
  0x2f   : > { %s809_s29 = smov 128   ;;  %s810_s3 = smov 8  }
  0x30   : > { %576 = dma.hbm_to_vmem [thread:$0]  (!%p906_p0), %s900_s30, 512, %s902_s4, %s147_s6, %s809_s29, %s809_s29, %s810_s3  }
  0x31   : > { %p188_p12 = scmp.lt.s32.totalorder %s806_s14, 3  ;;  %s556_s7 = sshll.u32 %s893_s25, 3 }
  0x32   : > { %s557_s8 = sshll.u32 %s802_s13, 7  ;;  %p1178_p9 = scmp.ge.s32.totalorder %s806_s14, 1 }
  0x33   : > { %s951_s19 = scalar_lea.hbm %s1169_s1, %s557_s8  ;;  %s174_s20 = scalar_lea.vmem [#allocation9], %s556_s7 }
  0x34   : > { %p944_p11 = pnand %p1178_p9, %p188_p12  ;;  %s183_s26 = sshll.u32 %s174_s20, 4  ;;  %s184_s26 = int_to_ptr.vmem [resolvable:$true] %s183_s26 }
  0x35   : > { %s171_s30 = scalar_lea.sflag [#allocation10], %s893_s25  ;;  %s690_s4 = scalar_lea.hbm %s951_s19, 128 }
  0x36   : > { %s1179_s15 = scalar_select %p944_p11, 1, 0 }
  0x37   : > { %p691_p1 = scmp.ne.s32.totalorder %s951_s19, %s690_s4  ;;  %s695_s28 = scalar_lea.hbm %s1169_s1, 256 }
  0x38   : > { %p696_p2 = scmp.lt.u32.totalorder %s951_s19, %s1169_s1  ;;  %p697_p5 = scmp.lt.u32.totalorder %s695_s28, %s690_s4 }
  0x39   : > { %p693_p6 = pnand %p691_p1, %p662_p3  ;;  %p699_p7 = scmp.lt.u32.totalorder %s690_s4, %s951_s19 }
  0x3a   : > { %p698_p4 = por %p697_p5, %p696_p2 }
  0x3b   : > { %p694_p13 = pneg %p693_p6 }
  0x3c   : > { %p700_p10 = por %p699_p7, %p698_p4 }
  0x3e   : > { %p701_p12 = pnand %p700_p10, %p694_p13 }
  0x40   : > { %704 = shalt.err (!%p701_p12)
}
  0x41   : > { %s705_s25 = scalar_lea.vmem %s184_s26, 128  ;;  %s811_s7 = smov [#allocation9]  }
  0x42   : > { %p706_p9 = scmp.ne.s32.totalorder %s184_s26, %s705_s25  ;;  %s710_s8 = sshll.u32 %s811_s7, 4  ;;  %s711_s8 = int_to_ptr.vmem [resolvable:$false] %s710_s8 }
  0x43   : > { %s712_s16 = scalar_lea.vmem %s711_s8, 256  ;;  %p713_p8 = scmp.lt.s32.totalorder %s184_s26, %s711_s8 }
  0x44   : > { %p708_p1 = pnand %p706_p9, %p662_p3  ;;  %p714_p11 = scmp.lt.s32.totalorder %s712_s16, %s705_s25 }
  0x46   : > { %p709_p6 = pneg %p708_p1  ;;  %p715_p2 = por %p714_p11, %p713_p8 }
  0x48   : > { %p716_p5 = pnand %p715_p2, %p709_p6 }
  0x4a   : > { %719 = shalt.err (!%p716_p5)
}
  0x4b   : > { %579 = dma.hbm_to_vmem [thread:$0]  (!%p906_p0), %s951_s19, 128, %s184_s26, %s171_s30  }
  0x4c   : > { %p1180_p13 = scmp.ne.s32.totalorder %s1179_s15, 0 }
  0x4d   : > { %s976_s18 = sand.u32 (!%p1180_p13), 1, %s790_s10   ;;  %p1181_p3 = scmp.ne.s32.totalorder (!%p1180_p13), %s1174_s21, 0 }
  0x4e   : > { %192 = sbr.rel (%p1180_p13) target bundleno = 170 (0xaa), region = 28  ;;  %s559_s20 = sshll.u32 (!%p1180_p13), %s976_s18, 5 }
  0x4f   : > { %s195_s4 = scalar_lea.sflag (!%p1180_p13), [#allocation7], %s976_s18  ;;  %s198_s6 = scalar_lea.vmem (!%p1180_p13), [#allocation6], %s559_s20 }
  0x55   : > { %773 = dma.done.wait (%p1181_p3), %s195_s4, 512  }
  0x56   : > { %775 = vsyncadd (%p1181_p3), %s195_s4, 4294966784  ;;  %s560_s5 = sshll.u32 %s976_s18, 3  ;;  %s204_s15 = scalar_lea.sflag [#allocation10], %s976_s18 }
  0x57   : > { %s207_s19 = scalar_lea.vmem [#allocation9], %s560_s5 }
  0x58   : > { %777 = dma.done.wait (%p1181_p3), %s204_s15, 128  }
  0x59   : > { %779 = vsyncadd (%p1181_p3), %s204_s15, 4294967168  ;;  %v990_v0 = vld [vmem:[%s198_s6] sm:$0xff]  ;;  %v992_v1 = vld [vmem:[%s198_s6 + $0x8] sm:$0xff]  ;;  %s561_s21 = sshll.u32 %s976_s18, 2  ;;  %vm416_vm8 = vcmask 1040384   ;;  %vm418_vm9 = vcmask 1041408  }
  0x5a   : > { %v994_v2 = vld [vmem:[%s198_s6 + $0x10] sm:$0xff]  ;;  %v996_v3 = vld [vmem:[%s198_s6 + $0x18] sm:$0xff]  ;;  %v257_v4 = vand.u32 2147483647, %v990_v0  ;;  %v258_v5 = vand.u32 2147483647, %v992_v1 }
  0x5b   : > { %v259_v6 = vand.u32 2147483647, %v994_v2  ;;  %v260_v7 = vand.u32 2147483647, %v996_v3  ;;  %v248_v16 = vld [vmem:[%s207_s19] sm:$0xff]  ;;  %v273_v36 = vmax.f32 %v990_v0, 0.0 }
  0x5c   : > { %v261_v8 = vsub.f32 0.0, %v257_v4  ;;  %v262_v9 = vsub.f32 0.0, %v258_v5  ;;  %v249_v18 = vunpack.c.0.s8 %v248_v16  ;;  %v250_v22 = vunpack.c.1.s8 %v248_v16  ;;  %s232_s26 = scalar_lea.vmem [#allocation11], %s561_s21  ;;  %s563_s27 = sshll.u32 %s798_s12, 6 }
  0x5d   : > { %v263_v10 = vsub.f32 0.0, %v259_v6  ;;  %v264_v11 = vsub.f32 0.0, %v260_v7  ;;  %v251_v23 = vunpack.c.2.s8 %v248_v16  ;;  %v252_v26 = vunpack.c.3.s8 %v248_v16  ;;  %s438_s30 = sshll.u32 %s232_s26, 4  ;;  %s1121_s3 = scalar_lea.hbm %s1170_s2, %s563_s27  ;;  %s1116_s30 = int_to_ptr.vmem [resolvable:$true] %s438_s30 }
  0x5e   : > { %v265_v12 = vmul.f32 1.442695, %v261_v8  ;;  %v267_v13 = vmul.f32 1.442695, %v262_v9  ;;  %v1020_v28 = vcvt.s32.f32 %v249_v18  ;;  %v1029_v32 = vcvt.s32.f32 %v250_v22  ;;  %s424_s25 = scalar_lea.sflag [#allocation8], %s976_s18  ;;  %s720_s7 = scalar_lea.vmem %s1116_s30, 64 }
  0x5f   : > { %v269_v14 = vmul.f32 1.442695, %v263_v10  ;;  %v271_v15 = vmul.f32 1.442695, %v264_v11  ;;  %v1031_v33 = vcvt.s32.f32 %v251_v23  ;;  %v1034_v35 = vcvt.s32.f32 %v252_v26  ;;  %p721_p8 = scmp.ne.s32.totalorder %s1116_s30, %s720_s7  ;;  %p1190_p0 = scmp.ne.s32.totalorder %s1175_s22, 0 }
  0x60   : > { %636 = vpow2.f32 %v265_v12  ;;  %v274_v37 = vmax.f32 %v992_v1, 0.0  ;;  %v277_v38 = vmul.f32 %v1020_v28, %v990_v0  ;;  %v275_v41 = vmax.f32 %v994_v2, 0.0  ;;  %s812_s12 = smov [#allocation11]  }
  0x61   : > { %638 = vpow2.f32 %v267_v13  ;;  %v278_v44 = vmul.f32 %v1029_v32, %v992_v1  ;;  %v276_v47 = vmax.f32 %v996_v3, 0.0  ;;  %v279_v48 = vmul.f32 %v1031_v33, %v994_v2  ;;  %p722_p11 = pnand %p721_p8, %p1190_p0  ;;  %s724_s8 = sshll.u32 %s812_s12, 4  ;;  %s725_s8 = int_to_ptr.vmem [resolvable:$false] %s724_s8 }
  0x62   : > { %640 = vpow2.f32 %v269_v14  ;;  %v280_v50 = vmul.f32 %v1034_v35, %v996_v3  ;;  %v281_v51 = vsub.f32 %v273_v36, %v277_v38  ;;  %v380_v58 = vadd.f32 %v1029_v32, %v1020_v28  ;;  %s726_s16 = scalar_lea.vmem %s725_s8, 128  ;;  %p727_p7 = scmp.lt.s32.totalorder %s1116_s30, %s725_s8 }
  0x63   : > { %642 = vpow2.f32 %v271_v15  ;;  %v282_v60 = vsub.f32 %v274_v37, %v278_v44  ;;  %v283_v5 = vsub.f32 %v275_v41, %v279_v48  ;;  %vm345_vm4 = vcmp.ge.f32.partialorder %v990_v0, 0.0  ;;  %p723_p4 = pneg %p722_p11  ;;  %p728_p10 = scmp.lt.s32.totalorder %s726_s16, %s720_s7 }
  0x64   : > { %v284_v8 = vsub.f32 %v276_v47, %v280_v50  ;;  %v381_v16 = vadd.f32 %v380_v58, %v1031_v33  ;;  %vm346_vm5 = vcmp.ge.f32.partialorder %v992_v1, 0.0  ;;  %vm347_vm6 = vcmp.ge.f32.partialorder %v994_v2, 0.0 }
  0x65   : > { %vm348_vm7 = vcmp.ge.f32.partialorder %v996_v3, 0.0  ;;  %vm420_vm10 = vcmask 1042432   ;;  %p729_p12 = por %p728_p10, %p727_p7 }
  0x67   : > { %p730_p9 = pnand %p729_p12, %p723_p4 }
  0x6a   : > { %v1002_v17 = vpop.eup %636 }
  0x6b   : > { %v1004_v19 = vpop.eup %638  ;;  %v1007_v20 = vadd.f32 1.0, %v1002_v17  ;;  %v288_v29 = vmul.f32 -0.5, %v1002_v17  ;;  %v291_v42 = vand.u32 2147483647, %v1002_v17 }
  0x6c   : > { %v1009_v21 = vpop.eup %640  ;;  %v1012_v24 = vadd.f32 1.0, %v1004_v19  ;;  %v297_v30 = vmul.f32 -0.5, %v1004_v19  ;;  %v300_v45 = vand.u32 2147483647, %v1004_v19 }
  0x6d   : > { %v1014_v25 = vpop.eup %642  ;;  %644 = vlog2.f32 %v1007_v20  ;;  %v1018_v27 = vadd.f32 1.0, %v1009_v21  ;;  %v306_v34 = vmul.f32 -0.5, %v1009_v21  ;;  %v289_v39 = vadd.f32 1.0, %v288_v29 }
  0x6e   : > { %646 = vlog2.f32 %v1012_v24  ;;  %v1027_v31 = vadd.f32 1.0, %v1014_v25  ;;  %v315_v40 = vmul.f32 -0.5, %v1014_v25  ;;  %v298_v43 = vadd.f32 1.0, %v297_v30 }
  0x6f   : > { %648 = vlog2.f32 %v1018_v27  ;;  %v307_v46 = vadd.f32 1.0, %v306_v34  ;;  %v309_v49 = vand.u32 2147483647, %v1009_v21  ;;  %v290_v52 = vmul.f32 %v1002_v17, %v289_v39 }
  0x70   : > { %650 = vlog2.f32 %v1027_v31  ;;  %v316_v53 = vadd.f32 1.0, %v315_v40  ;;  %vm1058_vm0 = vcmp.lt.f32.partialorder %v291_v42, 0.0004427343  ;;  %v299_v56 = vmul.f32 %v1004_v19, %v298_v43 }
  0x71   : > { %652 = vrcp.f32 %v1007_v20  ;;  %v318_v57 = vand.u32 2147483647, %v1014_v25  ;;  %vm1066_vm1 = vcmp.lt.f32.partialorder %v300_v45, 0.0004427343  ;;  %v308_v63 = vmul.f32 %v1009_v21, %v307_v46 }
  0x72   : > { %654 = vrcp.f32 %v1012_v24  ;;  %vm1071_vm2 = vcmp.lt.f32.partialorder %v309_v49, 0.0004427343  ;;  %v317_v11 = vmul.f32 %v1014_v25, %v316_v53  ;;  %v349_v46 = vsel %vm345_vm4, 1.0, %v1002_v17 }
  0x73   : > { %656 = vrcp.f32 %v1018_v27  ;;  %vm1080_vm3 = vcmp.lt.f32.partialorder %v318_v57, 0.0004427343  ;;  %v350_v49 = vsel %vm346_vm5, 1.0, %v1004_v19  ;;  %v352_v0 = vsel %vm348_vm7, 1.0, %v1014_v25 }
  0x74   : > { %658 = vrcp.f32 %v1027_v31 }
  0x77   : > { %v645_v54 = vpop.eup %644 }
  0x78   : > { %v647_v59 = vpop.eup %646  ;;  %v287_v61 = vmul.f32 0.6931472, %v645_v54 }
  0x79   : > { %v649_v4 = vpop.eup %648  ;;  %v296_v6 = vmul.f32 0.6931472, %v647_v59 }
  0x7a   : > { %v293_v9 = vsel %vm1058_vm0, %v290_v52, %v287_v61  ;;  %v305_v10 = vmul.f32 0.6931472, %v649_v4  ;;  %v651_v12 = vpop.eup %650 }
  0x7b   : > { %v302_v13 = vsel %vm1066_vm1, %v299_v56, %v296_v6  ;;  %v321_v15 = vadd.f32 %v293_v9, %v281_v51  ;;  %v653_v18 = vpop.eup %652  ;;  %v314_v23 = vmul.f32 0.6931472, %v651_v12 }
  0x7c   : > { %v311_v22 = vsel %vm1071_vm2, %v308_v63, %v305_v10  ;;  %v322_v26 = vadd.f32 %v302_v13, %v282_v60  ;;  %v655_v29 = vpop.eup %654  ;;  %v333_v34 = vmul.f32 %v653_v18, %v1007_v20  ;;  %v382_v20 = vadd.f32 %v381_v16, %v1034_v35 }
  0x7d   : > { %v323_v30 = vadd.f32 %v311_v22, %v283_v5  ;;  %v657_v36 = vpop.eup %656  ;;  %v320_v37 = vsel %vm1080_vm3, %v317_v11, %v314_v23  ;;  %v334_v38 = vmul.f32 %v655_v29, %v1012_v24 }
  0x7e   : > { %v358_v39 = vadd.f32 %v322_v26, %v321_v15  ;;  %v659_v40 = vpop.eup %658  ;;  %v324_v41 = vadd.f32 %v320_v37, %v284_v8  ;;  %v335_v42 = vmul.f32 %v657_v36, %v1018_v27  ;;  %v337_v43 = vsub.f32 2.0, %v333_v34 }
  0x7f   : > { %v336_v44 = vmul.f32 %v659_v40, %v1027_v31  ;;  %v338_v45 = vsub.f32 2.0, %v334_v38  ;;  %v351_v27 = vsel %vm347_vm6, 1.0, %v1009_v21  ;;  %v410_v56 = vrot.slane %v382_v20, 4 }
  0x80   : > { %v359_v47 = vadd.f32 %v358_v39, %v323_v30  ;;  %v339_v48 = vsub.f32 2.0, %v335_v42  ;;  %v341_v24 = vmul.f32 %v653_v18, %v337_v43 }
  0x81   : > { %v340_v50 = vsub.f32 2.0, %v336_v44  ;;  %v342_v51 = vmul.f32 %v655_v29, %v338_v45  ;;  %v411_v61 = vadd.f32 %v410_v56, %v382_v20 }
  0x82   : > { %v360_v52 = vadd.f32 %v359_v47, %v324_v41  ;;  %v343_v31 = vmul.f32 %v657_v36, %v339_v48  ;;  %v353_v17 = vmul.f32 %v349_v46, %v341_v24 }
  0x83   : > { %v344_v53 = vmul.f32 %v659_v40, %v340_v50  ;;  %v354_v54 = vmul.f32 %v350_v49, %v342_v51  ;;  %v412_v7 = vrot.slane %v411_v61, 2 }
  0x84   : > { %v389_v55 = vrot.slane %v360_v52, 4  ;;  %v355_v57 = vmul.f32 %v351_v27, %v343_v31  ;;  %v364_v1 = vmul.f32 %v353_v17, %v1020_v28 }
  0x85   : > { %v356_v19 = vmul.f32 %v352_v0, %v344_v53  ;;  %v365_v58 = vmul.f32 %v354_v54, %v1029_v32  ;;  %v374_v59 = vadd.f32 %v354_v54, %v353_v17  ;;  %v413_v11 = vadd.f32 %v412_v7, %v411_v61 }
  0x86   : > { %v390_v2 = vadd.f32 %v389_v55, %v360_v52  ;;  %v366_v21 = vmul.f32 %v355_v57, %v1031_v33 }
  0x87   : > { %v367_v60 = vmul.f32 %v356_v19, %v1034_v35  ;;  %v368_v3 = vadd.f32 %v365_v58, %v364_v1  ;;  %v375_v25 = vadd.f32 %v374_v59, %v355_v57  ;;  %v414_v15 = vrot.slane %v413_v11, 1 }
  0x88   : > { %v391_v4 = vrot.slane %v390_v2, 2 }
  0x89   : > { %v369_v62 = vadd.f32 %v368_v3, %v366_v21  ;;  %v376_v63 = vadd.f32 %v375_v25, %v356_v19  ;;  %v415_v26 = vadd.f32 %v414_v15, %v413_v11 }
  0x8a   : > { %v392_v28 = vadd.f32 %v391_v4, %v390_v2 }
  0x8b   : > { %v370_v5 = vadd.f32 %v369_v62, %v367_v60  ;;  %v403_v6 = vrot.slane %v376_v63, 4 }
  0x8c   : > { %v393_v33 = vrot.slane %v392_v28, 1 }
  0x8d   : > { %v396_v8 = vrot.slane %v370_v5, 4  ;;  %v404_v9 = vadd.f32 %v403_v6, %v376_v63 }
  0x8e   : > { %v394_v16 = vadd.f32 %v393_v33, %v392_v28 }
  0x8f   : > { %v397_v32 = vadd.f32 %v396_v8, %v370_v5  ;;  %v405_v10 = vrot.slane %v404_v9, 2 }
  0x91   : > { %v398_v35 = vrot.slane %v397_v32, 2  ;;  %v406_v12 = vadd.f32 %v405_v10, %v404_v9 }
  0x93   : > { %v399_v13 = vadd.f32 %v398_v35, %v397_v32  ;;  %v407_v14 = vrot.slane %v406_v12, 1 }
  0x95   : > { %v400_v18 = vrot.slane %v399_v13, 1  ;;  %v408_v22 = vadd.f32 %v407_v14, %v406_v12 }
  0x97   : > { %v401_v23 = vadd.f32 %v400_v18, %v399_v13 }
  0x99   : > { %v417_v29 = vsel %vm416_vm8, %v394_v16, %v401_v23 }
  0x9a   : > { %v419_v30 = vsel %vm418_vm9, %v417_v29, %v408_v22 }
  0x9b   : > { %v421_v34 = vsel %vm420_vm10, %v419_v30, %v415_v26 }
  0x9c   : > { %422 = vst [vmem:[%s232_s26] sm:$0xf] %v421_v34 }
  0x9d   : > { %733 = shalt.err (!%p730_p9)
}
  0x9e   : > { %s734_s18 = scalar_lea.hbm %s1121_s3, 64  ;;  %s738_s6 = scalar_lea.hbm %s1170_s2, 128 }
  0x9f   : > { %p735_p1 = scmp.ne.s32.totalorder %s1121_s3, %s734_s18  ;;  %p739_p5 = scmp.lt.u32.totalorder %s1121_s3, %s1170_s2 }
  0xa0   : > { %p740_p13 = scmp.lt.u32.totalorder %s738_s6, %s734_s18  ;;  %p742_p8 = scmp.lt.u32.totalorder %s734_s18, %s1121_s3 }
  0xa1   : > { %p736_p6 = pnand %p735_p1, %p1190_p0 }
  0xa2   : > { %p741_p3 = por %p740_p13, %p739_p5 }
  0xa3   : > { %p737_p2 = pneg %p736_p6 }
  0xa4   : > { %p743_p11 = por %p742_p8, %p741_p3 }
  0xa6   : > { %p744_p4 = pnand %p743_p11, %p737_p2 }
  0xa8   : > { %747 = shalt.err (!%p744_p4)
}
  0xa9   : > { %571 = dma.vmem_to_hbm [thread:$0]  (%p1190_p0), %s1116_s30, 64, %s1121_s3, %s424_s25  }
  0xaa PF: > { %s450_s19 = sand.u32 1, %s786_s9   ;;  %p1191_p7 = scmp.ne.s32.totalorder %s1176_s24, 0 }
  0xab   : > { %p1192_p10 = scmp.ge.s32.totalorder %s806_s14, 2  ;;  %s451_s21 = scalar_lea.sflag [#allocation8], %s450_s19 }
  0xad   : > { %p581_p12 = pnand %p1192_p10, %p1191_p7 }
  0xaf   : > { %781 = dma.done.wait (!%p581_p12), %s451_s21, 64  }
  0xb0   : > { %783 = vsyncadd (!%p581_p12), %s451_s21, 4294967232  ;;  %s21_s14 = sadd.s32 1, %s806_s14   ;;  %s1193_s9 = smov %s790_s10 }
  0xb1   : > { %p18_p9 = scmp.ge.s32.totalorder %s21_s14, 4   ;;  %s1194_s10 = smov %s794_s11 }
  0xb2   : > { %s1195_s11 = smov %s884_s23  ;;  %s1196_s12 = smov %s802_s13 }
  0xb3   : > { %s1197_s13 = smov %s1199_s17  ;;  %20 = sbr.rel (!%p18_p9) target bundleno = 8 (0x8), region = 94 }
  0xba   :  { %456 = vsyncpa [#allocation7], 1 }
  0xbb   :  { %458 = vsyncpa [#allocation7 + $0x1], 1 }
  0xbc   :  { %459 = vsyncpa [#allocation10], 1 }
  0xbd   :  { %461 = vsyncpa [#allocation10 + $0x1], 1 }
  0xbe   :  { %462 = vsyncpa [#allocation8], 1 }
  0xbf   :  { %464 = vsyncpa [#allocation8 + $0x1], 1 }

</bundles_post_ra>
